<compile_context>
chip_gen: v6e
topology: v6e:2x2x1
jax: 0.10.0
libtpu: 0.0.40
codegen_flags: <defaults>
</compile_context>

<pallas_src>
import functools

import jax
import jax.numpy as jnp
from jax.experimental import pallas as pl
from jax.experimental.pallas import tpu as pltpu


def _disc_kernel(x_ref, w1_ref, b1_ref, w2_ref, b2_ref, w3t_ref, b3_ref, o_ref,
                 *, compute_dtype):
    """Fused 3-layer MLP with LeakyReLU(0.1) activations.

    All operands are VMEM-resident; the three matmuls run on the MXU with f32
    accumulation, the LeakyReLU (compare + select) on the VPU.
    """
    x = x_ref[...]  # (bm, d_x) in compute_dtype (bf16 by default)

    # Layer 1: Linear(d_x -> 2*d_x) + [Dropout: identity in eval] + LeakyReLU(0.1)
    h1 = jnp.dot(x, w1_ref[...], preferred_element_type=jnp.float32) + b1_ref[...]
    h1 = jnp.where(h1 > 0, h1, 0.1 * h1)

    # Layer 2: Linear(2*d_x -> 2*d_x) + [Dropout: identity] + LeakyReLU(0.1)
    h2 = jnp.dot(h1.astype(compute_dtype), w2_ref[...],
                 preferred_element_type=jnp.float32) + b2_ref[...]
    h2 = jnp.where(h2 > 0, h2, 0.1 * h2)

    # Layer 3: Linear(2*d_x -> 1) + [Dropout: identity], emitted lane-dense as a
    # (1, bm) row:  w3^T (1, h)  contracted against  h2 (bm, h)  on the h axis.
    out_row = jax.lax.dot_general(
        w3t_ref[...], h2.astype(compute_dtype),
        dimension_numbers=(((1,), (1,)), ((), ())),
        preferred_element_type=jnp.float32,
    ) + b3_ref[...]                              # (1, bm)

    o_ref[0] = out_row.astype(o_ref.dtype)       # o_ref is (1, 1, bm)

    # TODO(synk): training-mode Dropout(0.2) masks (via pltpu.prng_seed /
    # pltpu.prng_random_bits) are not applied; forward matches eval() semantics.


def _round_up(n, m):
    return ((n + m - 1) // m) * m


def discriminator_forward(x, params, *, bm=512, compute_dtype=jnp.bfloat16):
    """Run the fused discriminator MLP.

    x: [B, d_x] float32.  params: dict of w1,b1,w2,b2,w3,b3 with w_i stored as
    (in, out) and b_i as (1, out).  Returns [B, 1] float32.
    """
    B, d_x = x.shape
    h = 2 * d_x

    # Pick the batch tile: big tiles amortize per-step pipeline overhead and
    # fill the MXU M dimension; keep >= 2 grid steps when the batch allows so
    # the "parallel" axis can shard across v7x's two TensorCores.
    if B >= 2 * bm:
        bm_eff = bm
    elif B > 8:
        bm_eff = _round_up(pl.cdiv(B, 2), 8)
    else:
        bm_eff = _round_up(max(B, 1), 8)
    B_pad = _round_up(B, bm_eff)
    n_tiles = B_pad // bm_eff

    xc = x.astype(compute_dtype)
    if B_pad != B:
        xc = jnp.pad(xc, ((0, B_pad - B), (0, 0)))

    w1 = params["w1"].astype(compute_dtype)                    # (d_x, h)
    w2 = params["w2"].astype(compute_dtype)                    # (h, h)
    w3t = params["w3"].reshape(1, h).astype(compute_dtype)     # (h, 1) -> (1, h)
    b1 = params["b1"].astype(jnp.float32)                      # (1, h)
    b2 = params["b2"].astype(jnp.float32)                      # (1, h)
    b3 = params["b3"].astype(jnp.float32)                      # (1, 1)

    full = lambda shape: pl.BlockSpec(shape, lambda i: (0,) * len(shape))

    out = pl.pallas_call(
        functools.partial(_disc_kernel, compute_dtype=compute_dtype),
        out_shape=jax.ShapeDtypeStruct((n_tiles, 1, bm_eff), jnp.float32),
        grid_spec=pltpu.PrefetchScalarGridSpec(
            num_scalar_prefetch=0,
            grid=(n_tiles,),
            in_specs=[
                pl.BlockSpec((bm_eff, d_x), lambda i: (i, 0)),  # x tile over batch
                full((d_x, h)),                                 # w1 (resident)
                full((1, h)),                                   # b1
                full((h, h)),                                   # w2
                full((1, h)),                                   # b2
                full((1, h)),                                   # w3^T
                full((1, 1)),                                   # b3
            ],
            out_specs=pl.BlockSpec((1, 1, bm_eff), lambda i: (i, 0, 0)),
        ),
        compiler_params=pltpu.CompilerParams(
            dimension_semantics=("parallel",),
        ),
    )(xc, w1, b1, w2, b2, w3t, b3)

    # (n_tiles, 1, bm) lane-dense rows -> (B, 1) column, dropping batch padding.
    return out.reshape(-1)[:B].reshape(B, 1)


def init_params(d_x, key):
    """Deterministic init matching nn.Linear shapes (stored transposed)."""
    h = 2 * d_x
    ks = jax.random.split(key, 6)

    def linear(kw, kb, fan_in, fan_out):
        # PyTorch default: U(-1/sqrt(fan_in), 1/sqrt(fan_in))
        bound = 1.0 / jnp.sqrt(fan_in)
        w = jax.random.uniform(kw, (fan_in, fan_out), jnp.float32, -bound, bound)
        b = jax.random.uniform(kb, (1, fan_out), jnp.float32, -bound, bound)
        return w, b

    w1, b1 = linear(ks[0], ks[1], d_x, h)
    w2, b2 = linear(ks[2], ks[3], h, h)
    w3, b3 = linear(ks[4], ks[5], h, 1)
    return {"w1": w1, "b1": b1, "w2": w2, "b2": b2, "w3": w3, "b3": b3}


def _reference(x, p, compute_dtype=jnp.bfloat16):
    """Pure-JAX reference (eval-mode forward, same bf16-operand / f32-acc path)."""
    def lin(a, w, b):
        return jnp.dot(a.astype(compute_dtype), w.astype(compute_dtype),
                       preferred_element_type=jnp.float32) + b

    lrelu = lambda v: jnp.where(v > 0, v, 0.1 * v)
    h1 = lrelu(lin(x, p["w1"], p["b1"]))
    h2 = lrelu(lin(h1, p["w2"], p["b2"]))
    return lin(h2, p["w3"], p["b3"])


if __name__ == "__main__":
    key = jax.random.PRNGKey(0)
    k_x, k_p = jax.random.split(key)

    d_x = 32       # feature dim of the discriminator input
    batch = 256    # small demo batch; wrapper tiles it as 2 grid steps of 128

    x = jax.random.normal(k_x, (batch, d_x), dtype=jnp.float32)
    params = init_params(d_x, k_p)

    out = discriminator_forward(x, params)
    out = jax.block_until_ready(out)

    ref = _reference(x, params)
    assert out.shape == (batch, 1)
    assert jnp.allclose(out, ref, atol=5e-3, rtol=5e-3), "mismatch vs reference"

    print("KERNEL_OK")
</pallas_src>

<mosaic_0001>
module attributes {stable_mosaic.version = 11 : i64} {
  func.func @_disc_kernel(%arg0: i32, %arg1: memref<128x32xbf16, #tpu.memory_space<vmem>>, %arg2: memref<32x64xbf16, #tpu.memory_space<vmem>>, %arg3: memref<1x64xf32, #tpu.memory_space<vmem>>, %arg4: memref<64x64xbf16, #tpu.memory_space<vmem>>, %arg5: memref<1x64xf32, #tpu.memory_space<vmem>>, %arg6: memref<1x64xbf16, #tpu.memory_space<vmem>>, %arg7: memref<1x1xf32, #tpu.memory_space<vmem>>, %arg8: memref<1x1x128xf32, #tpu.memory_space<vmem>>) attributes {dimension_semantics = [#tpu.dimension_semantics<parallel>], iteration_bounds = array<i64: 2>, scalar_prefetch = 0 : i64, scratch_operands = 0 : i64, tpu.core_type = #tpu.core_type<tc>, window_params = [{transform_indices = @transform_0, window_bounds = array<i64: 128, 32>}, {pipeline_mode = #tpu.pipeline_mode<synchronous>, transform_indices = @transform_1, window_bounds = array<i64: 32, 64>}, {pipeline_mode = #tpu.pipeline_mode<synchronous>, transform_indices = @transform_2, window_bounds = array<i64: 1, 64>}, {pipeline_mode = #tpu.pipeline_mode<synchronous>, transform_indices = @transform_3, window_bounds = array<i64: 64, 64>}, {pipeline_mode = #tpu.pipeline_mode<synchronous>, transform_indices = @transform_4, window_bounds = array<i64: 1, 64>}, {pipeline_mode = #tpu.pipeline_mode<synchronous>, transform_indices = @transform_5, window_bounds = array<i64: 1, 64>}, {pipeline_mode = #tpu.pipeline_mode<synchronous>, transform_indices = @transform_6, window_bounds = array<i64: 1, 1>}, {transform_indices = @transform_7, window_bounds = array<i64: 1, 1, 128>}]} {
    %c0 = arith.constant 0 : index
    %c0_0 = arith.constant 0 : index
    %0 = vector.load %arg1[%c0, %c0_0] : memref<128x32xbf16, #tpu.memory_space<vmem>>, vector<128x32xbf16>
    %c0_1 = arith.constant 0 : index
    %c0_2 = arith.constant 0 : index
    %1 = vector.load %arg2[%c0_1, %c0_2] : memref<32x64xbf16, #tpu.memory_space<vmem>>, vector<32x64xbf16>
    %cst = arith.constant dense<0.000000e+00> : vector<128x64xf32>
    %2 = tpu.matmul %0, %1, %cst {dimension_numbers = #tpu.dot_dimension_numbers<[1], [0], [0], [1], [0, 0, 1, 1], [], []>} : vector<128x32xbf16>, vector<32x64xbf16>, vector<128x64xf32> -> vector<128x64xf32>
    %c0_3 = arith.constant 0 : index
    %c0_4 = arith.constant 0 : index
    %3 = vector.load %arg3[%c0_3, %c0_4] : memref<1x64xf32, #tpu.memory_space<vmem>>, vector<1x64xf32>
    %4 = vector.broadcast %3 : vector<1x64xf32> to vector<128x64xf32>
    %5 = arith.addf %2, %4 : vector<128x64xf32>
    %cst_5 = arith.constant 0.000000e+00 : f32
    %6 = vector.broadcast %cst_5 : f32 to vector<128x64xf32>
    %7 = arith.cmpf ogt, %5, %6 : vector<128x64xf32>
    %cst_6 = arith.constant 1.000000e-01 : f32
    %8 = vector.broadcast %cst_6 : f32 to vector<128x64xf32>
    %9 = arith.mulf %8, %5 : vector<128x64xf32>
    %10 = arith.select %7, %5, %9 : vector<128x64xi1>, vector<128x64xf32>
    %11 = arith.truncf %10 : vector<128x64xf32> to vector<128x64xbf16>
    %c0_7 = arith.constant 0 : index
    %c0_8 = arith.constant 0 : index
    %12 = vector.load %arg4[%c0_7, %c0_8] : memref<64x64xbf16, #tpu.memory_space<vmem>>, vector<64x64xbf16>
    %cst_9 = arith.constant dense<0.000000e+00> : vector<128x64xf32>
    %13 = tpu.matmul %11, %12, %cst_9 {dimension_numbers = #tpu.dot_dimension_numbers<[1], [0], [0], [1], [0, 0, 1, 1], [], []>} : vector<128x64xbf16>, vector<64x64xbf16>, vector<128x64xf32> -> vector<128x64xf32>
    %c0_10 = arith.constant 0 : index
    %c0_11 = arith.constant 0 : index
    %14 = vector.load %arg5[%c0_10, %c0_11] : memref<1x64xf32, #tpu.memory_space<vmem>>, vector<1x64xf32>
    %15 = vector.broadcast %14 : vector<1x64xf32> to vector<128x64xf32>
    %16 = arith.addf %13, %15 : vector<128x64xf32>
    %cst_12 = arith.constant 0.000000e+00 : f32
    %17 = vector.broadcast %cst_12 : f32 to vector<128x64xf32>
    %18 = arith.cmpf ogt, %16, %17 : vector<128x64xf32>
    %cst_13 = arith.constant 1.000000e-01 : f32
    %19 = vector.broadcast %cst_13 : f32 to vector<128x64xf32>
    %20 = arith.mulf %19, %16 : vector<128x64xf32>
    %21 = arith.select %18, %16, %20 : vector<128x64xi1>, vector<128x64xf32>
    %c0_14 = arith.constant 0 : index
    %c0_15 = arith.constant 0 : index
    %22 = vector.load %arg6[%c0_14, %c0_15] : memref<1x64xbf16, #tpu.memory_space<vmem>>, vector<1x64xbf16>
    %23 = arith.truncf %21 : vector<128x64xf32> to vector<128x64xbf16>
    %cst_16 = arith.constant dense<0.000000e+00> : vector<1x128xf32>
    %24 = tpu.matmul %22, %23, %cst_16 {dimension_numbers = #tpu.dot_dimension_numbers<[1], [1], [0], [0], [0, 0, 1, 0], [], []>} : vector<1x64xbf16>, vector<128x64xbf16>, vector<1x128xf32> -> vector<1x128xf32>
    %c0_17 = arith.constant 0 : index
    %c0_18 = arith.constant 0 : index
    %25 = vector.load %arg7[%c0_17, %c0_18] : memref<1x1xf32, #tpu.memory_space<vmem>>, vector<1x1xf32>
    %26 = vector.broadcast %25 : vector<1x1xf32> to vector<1x128xf32>
    %27 = arith.addf %24, %26 : vector<1x128xf32>
    %c0_19 = arith.constant 0 : index
    %c0_20 = arith.constant 0 : index
    %c0_21 = arith.constant 0 : index
    %28 = vector.load %arg8[%c0_19, %c0_20, %c0_21] : memref<1x1x128xf32, #tpu.memory_space<vmem>>, vector<1x1x128xf32>
    %29 = vector.shape_cast %28 : vector<1x1x128xf32> to vector<1x128xf32>
    %30 = vector.shape_cast %27 : vector<1x128xf32> to vector<1x1x128xf32>
    tpu.vector_store %arg8[%c0_19, %c0_20, %c0_21], %30 {strides = array<i32>} : memref<1x1x128xf32, #tpu.memory_space<vmem>>, vector<1x1x128xf32>,
    return
  }
  func.func @transform_0(%arg0: i32) -> (i32, i32) {
    %c0_i32 = arith.constant 0 : i32
    %c0_i32_0 = arith.constant 0 : i32
    return %arg0, %c0_i32 : i32, i32
  }
  func.func @transform_1(%arg0: i32) -> (i32, i32) {
    %c0_i32 = arith.constant 0 : i32
    %c0_i32_0 = arith.constant 0 : i32
    %c0_i32_1 = arith.constant 0 : i32
    return %c0_i32, %c0_i32_0 : i32, i32
  }
  func.func @transform_2(%arg0: i32) -> (i32, i32) {
    %c0_i32 = arith.constant 0 : i32
    %c0_i32_0 = arith.constant 0 : i32
    %c0_i32_1 = arith.constant 0 : i32
    return %c0_i32, %c0_i32_0 : i32, i32
  }
  func.func @transform_3(%arg0: i32) -> (i32, i32) {
    %c0_i32 = arith.constant 0 : i32
    %c0_i32_0 = arith.constant 0 : i32
    %c0_i32_1 = arith.constant 0 : i32
    return %c0_i32, %c0_i32_0 : i32, i32
  }
  func.func @transform_4(%arg0: i32) -> (i32, i32) {
    %c0_i32 = arith.constant 0 : i32
    %c0_i32_0 = arith.constant 0 : i32
    %c0_i32_1 = arith.constant 0 : i32
    return %c0_i32, %c0_i32_0 : i32, i32
  }
  func.func @transform_5(%arg0: i32) -> (i32, i32) {
    %c0_i32 = arith.constant 0 : i32
    %c0_i32_0 = arith.constant 0 : i32
    %c0_i32_1 = arith.constant 0 : i32
    return %c0_i32, %c0_i32_0 : i32, i32
  }
  func.func @transform_6(%arg0: i32) -> (i32, i32) {
    %c0_i32 = arith.constant 0 : i32
    %c0_i32_0 = arith.constant 0 : i32
    %c0_i32_1 = arith.constant 0 : i32
    return %c0_i32, %c0_i32_0 : i32, i32
  }
  func.func @transform_7(%arg0: i32) -> (i32, i32, i32) {
    %c0_i32 = arith.constant 0 : i32
    %c0_i32_0 = arith.constant 0 : i32
    %c0_i32_1 = arith.constant 0 : i32
    return %arg0, %c0_i32, %c0_i32_0 : i32, i32, i32
  }
}

</mosaic_0001>

<bundles_post_ra>
// kernel: tpu_custom_call.1
= control target key start
LH: loop header
LB: loop body
LE: loop exit
PB: predicated region body
PF: predicated region fallthrough
CT: control target
= control target key end

     0   :  { %s1424_s0 = inlined_call_operand.vmem [shape: bf16[256,32], index: 0, kind: input, shape index: {}]   ;;  %s1425_s1 = inlined_call_operand.vmem [shape: bf16[32,64], index: 1, kind: input, shape index: {}]   ;;  %s1426_s2 = inlined_call_operand.vmem [shape: f32[1,64], index: 2, kind: input, shape index: {}]   ;;  %s1427_s3 = inlined_call_operand.vmem [shape: bf16[64,64], index: 3, kind: input, shape index: {}]   ;;  %s1428_s4 = inlined_call_operand.vmem [shape: f32[1,64], index: 4, kind: input, shape index: {}]   ;;  %s1429_s5 = inlined_call_operand.vmem [shape: bf16[1,64], index: 5, kind: input, shape index: {}]   ;;  %s1430_s6 = inlined_call_operand.<no memory space> [shape: f32[1,1], index: 6, kind: input, shape index: {}]   ;;  %s1431_s7 = inlined_call_operand.hbm [shape: f32[2,1,128], index: 7, kind: output, shape index: {}]  }
   0x1   :  { %v12_v0 = vstv %s1430_s6 }
   0x2   :  { %13 = vst [vmem:[#allocation2] sm:$0x1] %v12_v0 }
   0x3   :  { %14 = vsyncpa [#allocation4], 0 }
   0x4   :  { %16 = vsyncpa [#allocation4 + $0x1], 0  ;;  %s1205_s26 = smov 0   ;;  %s1207_s27 = smov 0  }
   0x5   :  { %s1209_s28 = smov 0   ;;  %s1211_s29 = smov 0  }
   0x6 LB: > { %s901_s6 = sadd.s32 4294967295, %s1156_s29   ;;  %s902_s30 = sadd.s32 4294967294, %s1156_s29   ;;  %s1156_s29 = sphi %s1211_s29, %s1437_s29   ;;  %s1152_s28 = sphi %s1209_s28, %s1436_s28   ;;  %s1148_s27 = sphi %s1207_s27, %s1435_s27   ;;  %s1144_s26 = sphi %s1205_s26, %s1434_s26  }
   0x7   : > { %s1228_s8 = sadd.s32 1, %s1156_s29   ;;  %s181_s9 = sadd.s32 1, %s1152_s28 }
   0x8   : > { %s178_s10 = ssub.s32 %s1156_s29, %s1228_s8  ;;  %p191_p0 = scmp.ne.s32.totalorder %s1152_s28, %s1148_s27 }
   0x9   : > { %p179_p1 = scmp.eq.s32.totalorder %s178_s10, 0  ;;  %p192_p2 = scmp.eq.s32.totalorder %s901_s6, 1 }
   0xa   : > { %p197_p3 = scmp.ne.s32.totalorder %s1148_s27, %s1144_s26  ;;  %p198_p4 = scmp.eq.s32.totalorder %s902_s30, 1 }
   0xb   : > { %s1238_s11 = scalar_select %p179_p1, %s1152_s28, %s181_s9  }
   0xc   : > { %p1240_p5 = por %p192_p2, %p191_p0  ;;  %p1244_p6 = por %p198_p4, %p197_p3 }
   0xd   : > { %p905_p7 = scmp.ge.s32.totalorder %s1156_s29, 1  ;;  %p243_p8 = scmp.lt.s32.totalorder %s1156_s29, 3 }
   0xf   : > { %p244_p9 = pnand %p905_p7, %p243_p8 }
  0x10   : > { %s1253_s16 = sshll.u32 (!%p244_p9), %s901_s6, 4  ;;  %s272_s23 = sand.u32 (!%p244_p9), 1, %s1148_s27  }
  0x11   : > { %247 = sbr.rel (%p244_p9) target bundleno = 739 (0x2e3), region = 48  ;;  %p275_p10 = scmp.lt.s32.totalorder (!%p244_p9), %s1253_s16, 31 }
  0x12   : > { %s273_s24 = scalar_lea.vmem (!%p244_p9), [#allocation3], %s272_s23  ;;  %s1383_s9 = scalar_lea.hbm (!%p244_p9), %s1431_s7, %s1253_s16 }
  0x13   : > { %s835_s10 = scalar_lea.sflag (!%p244_p9), [#allocation4], %s272_s23  ;;  %s1161_s15 = smov (!%p244_p9), [#allocation3]  }
  0x14   : > { %s1100_s17 = sshll.u32 (!%p244_p9), %s1161_s15, 4  ;;  %s1101_s17 = int_to_ptr.vmem [resolvable:$false] %s1100_s17 }
  0x15   : > { %s1102_s18 = scalar_lea.vmem (!%p244_p9), %s1101_s17, 32 }
  0x16   : > { %v1082_v1 = vld [vmem:[%s1425_s1 + $0x8] sm:$0xff]   ;;  %v1083_v2 = vld [vmem:[%s1425_s1] sm:$0xff]   ;;  %s276_s19 = scalar_select %p275_p10, %s1253_s16, 31  ;;  %v1092_v3 = vld [vmem:[%s1427_s3 + $0x18] sm:$0xff]   ;;  %vm360_vm0 = vcmask 261120   ;;  %vm577_vm5 = vcmask 523264  }
  0x17   : > { %975 = vmatprep.subr.bf16.mxu1 %v1082_v1  ;;  %v1093_v4 = vld [vmem:[%s1427_s3 + $0x10] sm:$0xff]   ;;  %v1094_v8 = vld [vmem:[%s1427_s3 + $0x8] sm:$0xff]   ;;  %v1095_v14 = vld [vmem:[%s1427_s3] sm:$0xff]  }
  0x18   : > { %976 = vmatpush3.bf16.msra.mxu1 %v1082_v1  ;;  %s907_s22 = sshll.u32 %s276_s19, 2  ;;  %v1286_v16 = vld [vmem:[%s1426_s2] ss:$0 sm:$0xff] }
  0x19   : > { %977 = vmatprep.subr.bf16.mxu1 %v1083_v2  ;;  %s278_s25 = scalar_lea.vmem %s1424_s0, %s907_s22 }
  0x1a   : > { %v1084_v5 = vld [vmem:[%s278_s25] sm:$0xff]   ;;  %v1085_v6 = vld [vmem:[%s278_s25 + $0x8] sm:$0xff]   ;;  %v1086_v7 = vld [vmem:[%s278_s25 + $0x10] sm:$0xff]  }
  0x1b   : > { %979 = vmatprep.mubr.msk.bf16.mxu1 %vm360_vm0, %v1084_v5  ;;  %v1087_v9 = vld [vmem:[%s278_s25 + $0x18] sm:$0xff]   ;;  %v1088_v10 = vld [vmem:[%s278_s25 + $0x20] sm:$0xff]   ;;  %v1089_v11 = vld [vmem:[%s278_s25 + $0x28] sm:$0xff]  }
  0x1c   : > { %978 = vmatpush3.bf16.msra.mxu1 %v1083_v2  ;;  %v1090_v12 = vld [vmem:[%s278_s25 + $0x30] sm:$0xff]   ;;  %v1091_v13 = vld [vmem:[%s278_s25 + $0x38] sm:$0xff]   ;;  %s847_s25 = sshll.u32 %s273_s24, 4  ;;  %s1385_s25 = int_to_ptr.vmem [resolvable:$true] %s847_s25 }
  0x1d   : > { %995 = vmatprep.subr.bf16.mxu1 %v1092_v3  ;;  %s1096_s14 = scalar_lea.vmem %s1385_s25, 16  ;;  %p1103_p0 = scmp.lt.s32.totalorder %s1385_s25, %s1101_s17 }
  0x1e   : > { %p1097_p11 = scmp.ne.s32.totalorder %s1385_s25, %s1096_s14  ;;  %p1104_p1 = scmp.lt.s32.totalorder %s1102_s18, %s1096_s14 }
  0x1f   : > { %980 = vmatmul.mubr.msk.bf16.vlgmr.msra.gmra.mxu1 %vm360_vm0, %v1085_v6 }
  0x20   : > { %983 = vmatprep.mubr.msk.bf16.mxu1 %vm360_vm0, %v1086_v7  ;;  %996 = vmatpush3.bf16.msra.mxu1 %v1092_v3  ;;  %p1098_p12 = pnand %p1097_p11, %p1240_p5  ;;  %p1105_p2 = por %p1104_p1, %p1103_p0 }
  0x21   : > { %997 = vmatprep.subr.bf16.mxu1 %v1093_v4 }
  0x22   : > { %p1099_p13 = pneg %p1098_p12 }
  0x24   : > { %998 = vmatpush3.bf16.msra.mxu1 %v1093_v4  ;;  %p1106_p3 = pnand %p1105_p2, %p1099_p13 }
  0x25   : > { %999 = vmatprep.subr.bf16.mxu1 %v1094_v8 }
  0x27   : > { %984 = vmatmul.mubr.msk.bf16.gmra.mxu1 %vm360_vm0, %v1087_v9 }
  0x28   : > { %987 = vmatprep.mubr.msk.bf16.mxu1 %vm360_vm0, %v1088_v10  ;;  %1000 = vmatpush3.bf16.msra.mxu1 %v1094_v8 }
  0x29   : > { %1001 = vmatprep.subr.bf16.mxu1 %v1095_v14 }
  0x2c   : > { %1002 = vmatpush3.bf16.msra.mxu1 %v1095_v14 }
  0x2f   : > { %988 = vmatmul.mubr.msk.bf16.gmra.mxu1 %vm360_vm0, %v1089_v11 }
  0x30   : > { %991 = vmatprep.mubr.msk.bf16.mxu1 %vm360_vm0, %v1090_v12 }
  0x37   : > { %992 = vmatmul.mubr.msk.bf16.gmra.mxu1 %vm360_vm0, %v1091_v13 }
  0xdf   : > { %v981_v15 = vpop.f32.mrf.mxu1 }
  0xe0   : > { %v428_v19 = vadd.f32 %v981_v15, %v1286_v16 }
  0xe1   : > { %v419_v17 = vpop.f32.mrf.mxu1 }
  0xe2   : > { %v420_v18 = vadd.f32 %v1286_v16, %v419_v17  ;;  %v500_v26 = vmul.f32 0.1, %v428_v19  ;;  %vm484_vm3 = vcmp.gt.f32.partialorder %v428_v19, 0.0 }
  0xe3   : > { %v982_v20 = vpop.f32.mrf.mxu1 }
  0xe4   : > { %v431_v21 = vadd.f32 %v982_v20, %v1286_v16  ;;  %v498_v23 = vmul.f32 0.1, %v420_v18  ;;  %vm482_vm2 = vcmp.gt.f32.partialorder %v420_v18, 0.0  ;;  %v516_v34 = vsel %vm484_vm3, %v428_v19, %v500_v26 }
  0xe5   : > { %v422_v22 = vpop.f32.mrf.mxu1  ;;  %v1160_v26 = vmov 0  }
  0xe6   : > { %vm485_vm1 = vcmp.gt.f32.partialorder %v431_v21, 0.0  ;;  %v501_v24 = vmul.f32 0.1, %v431_v21  ;;  %v423_v25 = vadd.f32 %v1286_v16, %v422_v22  ;;  %v514_v31 = vsel %vm482_vm2, %v420_v18, %v498_v23  ;;  %1081 = vset.pattern.permute.xlu0 %v1160_v26 }
  0xe7   : > { %v985_v27 = vpop.f32.mrf.mxu1  ;;  %vm1159_vm2 = vmmov 0  }
  0xe8   : > { %vm483_vm4 = vcmp.gt.f32.partialorder %v423_v25, 0.0  ;;  %v499_v28 = vmul.f32 0.1, %v423_v25  ;;  %v517_v29 = vsel %vm485_vm1, %v431_v21, %v501_v24  ;;  %v444_v36 = vadd.f32 %v985_v27, %v1286_v16  ;;  %v1317_v27 = vld [vmem:[%s1428_s4] ss:$0 sm:$0xff] }
  0xe9   : > { %v435_v30 = vpop.f32.mrf.mxu1  ;;  %v531_v38 = vpack.c.bf16 %v517_v29, %v516_v34 }
  0xea   : > { %v515_v32 = vsel %vm483_vm4, %v423_v25, %v499_v28  ;;  %v436_v33 = vadd.f32 %v1286_v16, %v435_v30  ;;  %v504_v44 = vmul.f32 0.1, %v444_v36  ;;  %vm488_vm8 = vcmp.gt.f32.partialorder %v444_v36, 0.0 }
  0xeb   : > { %v530_v35 = vpack.c.bf16 %v515_v32, %v514_v31  ;;  %v986_v37 = vpop.f32.mrf.mxu1  ;;  %v1158_v25 = vmov 0.0  }
  0xec   : > { %v447_v39 = vadd.f32 %v986_v37, %v1286_v16  ;;  %v502_v41 = vmul.f32 0.1, %v436_v33  ;;  %vm486_vm7 = vcmp.gt.f32.partialorder %v436_v33, 0.0  ;;  %v520_v52 = vsel %vm488_vm8, %v444_v36, %v504_v44  ;;  %1019 = vmatprep.subr.bf16.mxu0 %v1158_v25  ;;  %1035 = vmatprep.mubr.msk.bf16.mxu0 %vm1159_vm2, %v1158_v25 }
  0xed   : > { %v438_v40 = vpop.f32.mrf.mxu1  ;;  %1003 = vmatprep.mubr.msk.bf16.mxu1 %vm577_vm5, %v530_v35 }
  0xee   : > { %vm489_vm6 = vcmp.gt.f32.partialorder %v447_v39, 0.0  ;;  %v505_v42 = vmul.f32 0.1, %v447_v39  ;;  %v439_v43 = vadd.f32 %v1286_v16, %v438_v40  ;;  %1004 = vmatmul.mubr.msk.bf16.vlgmr.msra.gmra.mxu1 %vm577_vm5, %v531_v38  ;;  %v518_v49 = vsel %vm486_vm7, %v436_v33, %v502_v41 }
  0xef   : > { %v989_v45 = vpop.f32.mrf.mxu1 }
  0xf0   : > { %vm487_vm9 = vcmp.gt.f32.partialorder %v439_v43, 0.0  ;;  %v503_v46 = vmul.f32 0.1, %v439_v43  ;;  %v521_v47 = vsel %vm489_vm6, %v447_v39, %v505_v42  ;;  %v460_v54 = vadd.f32 %v989_v45, %v1286_v16 }
  0xf1   : > { %v451_v48 = vpop.f32.mrf.mxu1  ;;  %v533_v56 = vpack.c.bf16 %v521_v47, %v520_v52 }
  0xf2   : > { %v519_v50 = vsel %vm487_vm9, %v439_v43, %v503_v46  ;;  %v452_v51 = vadd.f32 %v1286_v16, %v451_v48  ;;  %v508_v62 = vmul.f32 0.1, %v460_v54  ;;  %vm492_vm12 = vcmp.gt.f32.partialorder %v460_v54, 0.0 }
  0xf3   : > { %v532_v53 = vpack.c.bf16 %v519_v50, %v518_v49  ;;  %v990_v55 = vpop.f32.mrf.mxu1 }
  0xf4   : > { %v463_v57 = vadd.f32 %v990_v55, %v1286_v16  ;;  %v506_v59 = vmul.f32 0.1, %v452_v51  ;;  %vm490_vm11 = vcmp.gt.f32.partialorder %v452_v51, 0.0  ;;  %v524_v6 = vsel %vm492_vm12, %v460_v54, %v508_v62 }
  0xf5   : > { %v454_v58 = vpop.f32.mrf.mxu1  ;;  %1007 = vmatprep.mubr.msk.bf16.mxu1 %vm577_vm5, %v532_v53 }
  0xf6   : > { %vm493_vm10 = vcmp.gt.f32.partialorder %v463_v57, 0.0  ;;  %v509_v60 = vmul.f32 0.1, %v463_v57  ;;  %v455_v61 = vadd.f32 %v1286_v16, %v454_v58  ;;  %1008 = vmatmul.mubr.msk.bf16.gmra.mxu1 %vm577_vm5, %v533_v56  ;;  %v522_v3 = vsel %vm490_vm11, %v452_v51, %v506_v59 }
  0xf7   : > { %v993_v63 = vpop.f32.mrf.mxu1 }
  0xf8   : > { %vm491_vm13 = vcmp.gt.f32.partialorder %v455_v61, 0.0  ;;  %v507_v0 = vmul.f32 0.1, %v455_v61  ;;  %v525_v1 = vsel %vm493_vm10, %v463_v57, %v509_v60  ;;  %v476_v8 = vadd.f32 %v993_v63, %v1286_v16 }
  0xf9   : > { %v467_v2 = vpop.f32.mrf.mxu1  ;;  %v535_v10 = vpack.c.bf16 %v525_v1, %v524_v6 }
  0xfa   : > { %v523_v4 = vsel %vm491_vm13, %v455_v61, %v507_v0  ;;  %v468_v5 = vadd.f32 %v1286_v16, %v467_v2  ;;  %v512_v17 = vmul.f32 0.1, %v476_v8  ;;  %vm496_vm0 = vcmp.gt.f32.partialorder %v476_v8, 0.0 }
  0xfb   : > { %v534_v7 = vpack.c.bf16 %v523_v4, %v522_v3  ;;  %v994_v9 = vpop.f32.mrf.mxu1 }
  0xfc   : > { %v479_v11 = vadd.f32 %v994_v9, %v1286_v16  ;;  %v510_v13 = vmul.f32 0.1, %v468_v5  ;;  %vm494_vm15 = vcmp.gt.f32.partialorder %v468_v5, 0.0  ;;  %v528_v22 = vsel %vm496_vm0, %v476_v8, %v512_v17 }
  0xfd   : > { %v470_v12 = vpop.f32.mrf.mxu1  ;;  %1011 = vmatprep.mubr.msk.bf16.mxu1 %vm577_vm5, %v534_v7 }
  0xfe   : > { %vm497_vm14 = vcmp.gt.f32.partialorder %v479_v11, 0.0  ;;  %v513_v14 = vmul.f32 0.1, %v479_v11  ;;  %v471_v15 = vadd.f32 %v1286_v16, %v470_v12  ;;  %1012 = vmatmul.mubr.msk.bf16.gmra.mxu1 %vm577_vm5, %v535_v10  ;;  %v526_v20 = vsel %vm494_vm15, %v468_v5, %v510_v13  ;;  %v756_v16 = vld [vmem:[#allocation2] sm:$0x1] }
  0xff   : > { %759 = vperm.xlu0 %1081, %v756_v16  }
 0x100   : > { %vm495_vm1 = vcmp.gt.f32.partialorder %v471_v15, 0.0  ;;  %v511_v18 = vmul.f32 0.1, %v471_v15  ;;  %v529_v19 = vsel %vm497_vm14, %v479_v11, %v513_v14 }
 0x101   : > { %v537_v24 = vpack.c.bf16 %v529_v19, %v528_v22 }
 0x102   : > { %v527_v21 = vsel %vm495_vm1, %v471_v15, %v511_v18 }
 0x103   : > { %v536_v23 = vpack.c.bf16 %v527_v21, %v526_v20 }
 0x105   : > { %1015 = vmatprep.mubr.msk.bf16.mxu1 %vm577_vm5, %v536_v23 }
 0x106   : > { %1016 = vmatmul.mubr.msk.bf16.gmra.mxu1 %vm577_vm5, %v537_v24 }
 0x1ae   : > { %v1005_v28 = vpop.f32.mrf.mxu1 }
 0x1af   : > { %v645_v29 = vadd.f32 %v1005_v28, %v1317_v27 }
 0x1b0   : > { %v636_v30 = vpop.f32.mrf.mxu1 }
 0x1b1   : > { %v637_v31 = vadd.f32 %v1317_v27, %v636_v30  ;;  %v717_v33 = vmul.f32 0.1, %v645_v29  ;;  %vm701_vm3 = vcmp.gt.f32.partialorder %v645_v29, 0.0 }
 0x1b2   : > { %v1006_v32 = vpop.f32.mrf.mxu1 }
 0x1b3   : > { %v648_v34 = vadd.f32 %v1006_v32, %v1317_v27  ;;  %v715_v36 = vmul.f32 0.1, %v637_v31  ;;  %vm699_vm6 = vcmp.gt.f32.partialorder %v637_v31, 0.0  ;;  %v1325_v41 = vsel %vm701_vm3, %v645_v29, %v717_v33 }
 0x1b4   : > { %v639_v35 = vpop.f32.mrf.mxu1 }
 0x1b5   : > { %vm702_vm4 = vcmp.gt.f32.partialorder %v648_v34, 0.0  ;;  %v718_v37 = vmul.f32 0.1, %v648_v34  ;;  %v640_v38 = vadd.f32 %v1317_v27, %v639_v35  ;;  %v1333_v45 = vsel %vm699_vm6, %v637_v31, %v715_v36 }
 0x1b6   : > { %v1323_v39 = vpop.f32.mrf.mxu1 }
 0x1b7   : > { %vm700_vm7 = vcmp.gt.f32.partialorder %v640_v38, 0.0  ;;  %v716_v40 = vmul.f32 0.1, %v640_v38  ;;  %v1327_v42 = vsel %vm702_vm4, %v648_v34, %v718_v37  ;;  %v661_v16 = vadd.f32 %v1323_v39, %v1317_v27 }
 0x1b8   : > { %v1329_v43 = vpop.f32.mrf.mxu1  ;;  %v749_v44 = vpack.c.bf16 %v1327_v42, %v1325_v41 }
 0x1b9   : > { %v1335_v46 = vsel %vm700_vm7, %v640_v38, %v716_v40  ;;  %v721_v30 = vmul.f32 0.1, %v661_v16  ;;  %vm705_vm1 = vcmp.gt.f32.partialorder %v661_v16, 0.0  ;;  %v653_v34 = vadd.f32 %v1317_v27, %v1329_v43 }
 0x1ba   : > { %v1010_v47 = vpop.f32.mrf.mxu1  ;;  %v748_v48 = vpack.c.bf16 %v1335_v46, %v1333_v45 }
 0x1bb   : > { %v664_v23 = vadd.f32 %v1010_v47, %v1317_v27  ;;  %v737_v35 = vsel %vm705_vm1, %v661_v16, %v721_v30  ;;  %v719_v38 = vmul.f32 0.1, %v653_v34  ;;  %vm703_vm3 = vcmp.gt.f32.partialorder %v653_v34, 0.0 }
 0x1bc   : > { %v655_v49 = vpop.f32.mrf.mxu1  ;;  %v770_v43 = vsel %vm577_vm5, %v748_v48, 0 }
 0x1bd   : > { %v722_v29 = vmul.f32 0.1, %v664_v23  ;;  %vm706_vm0 = vcmp.gt.f32.partialorder %v664_v23, 0.0  ;;  %v656_v32 = vadd.f32 %v1317_v27, %v655_v49  ;;  %v735_v47 = vsel %vm703_vm3, %v653_v34, %v719_v38 }
 0x1be   : > { %v1013_v50 = vpop.f32.mrf.mxu1 }
 0x1bf   : > { %v677_v8 = vadd.f32 %v1013_v50, %v1317_v27  ;;  %v738_v33 = vsel %vm706_vm0, %v664_v23, %v722_v29  ;;  %v720_v37 = vmul.f32 0.1, %v656_v32  ;;  %vm704_vm2 = vcmp.gt.f32.partialorder %v656_v32, 0.0 }
 0x1c0   : > { %v668_v51 = vpop.f32.mrf.mxu1  ;;  %v751_v36 = vpack.c.bf16 %v738_v33, %v737_v35 }
 0x1c1   : > { %v725_v12 = vmul.f32 0.1, %v677_v8  ;;  %vm709_vm13 = vcmp.gt.f32.partialorder %v677_v8, 0.0  ;;  %v669_v17 = vadd.f32 %v1317_v27, %v668_v51  ;;  %v736_v40 = vsel %vm704_vm2, %v656_v32, %v720_v37  ;;  %v747_v51 = vld [vmem:[%s1429_s5] sm:$0x1] }
 0x1c2   : > { %v1014_v52 = vpop.f32.mrf.mxu1  ;;  %v779_v39 = vsel %vm577_vm5, %v751_v36, 0  ;;  %v750_v49 = vpack.c.bf16 %v736_v40, %v735_v47 }
 0x1c3   : > { %v680_v6 = vadd.f32 %v1014_v52, %v1317_v27  ;;  %v741_v18 = vsel %vm709_vm13, %v677_v8, %v725_v12  ;;  %v723_v21 = vmul.f32 0.1, %v669_v17  ;;  %vm707_vm15 = vcmp.gt.f32.partialorder %v669_v17, 0.0 }
 0x1c4   : > { %v671_v53 = vpop.f32.mrf.mxu1  ;;  %v776_v50 = vsel %vm577_vm5, %v750_v49, 0  ;;  %v762_v52 = vlaneseq }
 0x1c5   : > { %v726_v11 = vmul.f32 0.1, %v680_v6  ;;  %vm710_vm12 = vcmp.gt.f32.partialorder %v680_v6, 0.0  ;;  %v672_v14 = vadd.f32 %v1317_v27, %v671_v53  ;;  %v739_v26 = vsel %vm707_vm15, %v669_v17, %v723_v21 }
 0x1c6   : > { %v1017_v54 = vpop.f32.mrf.mxu1  ;;  %v763_v41 = vshrl.u32 %v762_v52, 7 }
 0x1c7   : > { %v693_v55 = vadd.f32 %v1017_v54, %v1317_v27  ;;  %v742_v15 = vsel %vm710_vm12, %v680_v6, %v726_v11  ;;  %v724_v20 = vmul.f32 0.1, %v672_v14  ;;  %vm708_vm14 = vcmp.gt.f32.partialorder %v672_v14, 0.0 }
 0x1c8   : > { %v684_v56 = vpop.f32.mrf.mxu1  ;;  %v753_v19 = vpack.c.bf16 %v742_v15, %v741_v18  ;;  %v764_v42 = vsub.s32 0, %v763_v41 }
 0x1c9   : > { %v729_v58 = vmul.f32 0.1, %v693_v55  ;;  %vm713_vm8 = vcmp.gt.f32.partialorder %v693_v55, 0.0  ;;  %v685_v61 = vadd.f32 %v1317_v27, %v684_v56  ;;  %v740_v24 = vsel %vm708_vm14, %v672_v14, %v724_v20 }
 0x1ca   : > { %v1018_v57 = vpop.f32.mrf.mxu1  ;;  %v785_v22 = vsel %vm577_vm5, %v753_v19, 0  ;;  %v752_v28 = vpack.c.bf16 %v740_v24, %v739_v26 }
 0x1cb   : > { %v696_v59 = vadd.f32 %v1018_v57, %v1317_v27  ;;  %v745_v1 = vsel %vm713_vm8, %v693_v55, %v729_v58  ;;  %v727_v4 = vmul.f32 0.1, %v685_v61  ;;  %vm711_vm11 = vcmp.gt.f32.partialorder %v685_v61, 0.0 }
 0x1cc   : > { %v687_v60 = vpop.f32.mrf.mxu1  ;;  %v782_v31 = vsel %vm577_vm5, %v752_v28, 0 }
 0x1cd   : > { %vm714_vm9 = vcmp.gt.f32.partialorder %v696_v59, 0.0  ;;  %v730_v62 = vmul.f32 0.1, %v696_v59  ;;  %v688_v63 = vadd.f32 %v1317_v27, %v687_v60  ;;  %v743_v9 = vsel %vm711_vm11, %v685_v61, %v727_v4 }
 0x1ce   : > { %v773_v27 = vsel %vm577_vm5, %v749_v44, 0  ;;  %v760_v44 = vpop.permute.xlu0 %759 }
 0x1cf   : > { %v728_v0 = vmul.f32 0.1, %v688_v63  ;;  %v746_v2 = vsel %vm714_vm9, %v696_v59, %v730_v62  ;;  %vm712_vm10 = vcmp.gt.f32.partialorder %v688_v63, 0.0  ;;  %v765_v53 = vrot.slane %v760_v44, %v764_v42 }
 0x1d0   : > { %v755_v3 = vpack.c.bf16 %v746_v2, %v745_v1 }
 0x1d1   : > { %v744_v7 = vsel %vm712_vm10, %v688_v63, %v728_v0 }
 0x1d2   : > { %v791_v5 = vsel %vm577_vm5, %v755_v3, 0  ;;  %v754_v10 = vpack.c.bf16 %v744_v7, %v743_v9 }
 0x1d3   : > { %1020 = vmatpush3.bf16.xpose.msra.mxu0 %v791_v5 }
 0x1d4   : > { %1021 = vmatprep.subr.bf16.mxu0 %v1158_v25  ;;  %v788_v13 = vsel %vm577_vm5, %v754_v10, 0 }
 0x1db   : > { %1022 = vmatpush3.bf16.xpose.msra.mxu0 %v788_v13 }
 0x1dc   : > { %1023 = vmatprep.subr.bf16.mxu0 %v1158_v25 }
 0x1e3   : > { %1024 = vmatpush3.bf16.xpose.msra.mxu0 %v785_v22 }
 0x1e4   : > { %1025 = vmatprep.subr.bf16.mxu0 %v1158_v25 }
 0x1eb   : > { %1026 = vmatpush3.bf16.xpose.msra.mxu0 %v782_v31 }
 0x1ec   : > { %1027 = vmatprep.subr.bf16.mxu0 %v1158_v25 }
 0x1f3   : > { %1028 = vmatpush3.bf16.xpose.msra.mxu0 %v779_v39 }
 0x1f4   : > { %1029 = vmatprep.subr.bf16.mxu0 %v1158_v25 }
 0x1fb   : > { %1030 = vmatpush3.bf16.xpose.msra.mxu0 %v776_v50 }
 0x1fc   : > { %1031 = vmatprep.subr.bf16.mxu0 %v1158_v25 }
 0x203   : > { %1032 = vmatpush3.bf16.xpose.msra.mxu0 %v773_v27 }
 0x204   : > { %1033 = vmatprep.subr.bf16.mxu0 %v1158_v25 }
 0x20b   : > { %1034 = vmatpush3.bf16.xpose.msra.mxu0 %v770_v43 }
 0x212   : > { %1036 = vmatmul.mubr.msk.bf16.vlgmr.msra.gmra.mxu0 %vm577_vm5, %v747_v51 }
 0x2d2   : > { %v827_v25 = vpop.f32.mrf.mxu0 }
 0x2d3   : > { %v828_v45 = vadd.f32 %v827_v25, %v765_v53 }
 0x2d4   : > { %v1037_v46 = vpop.f32.mrf.mxu0 }
 0x2d5   : > { %833 = vst [vmem:[%s273_s24] sm:$0x1] %v828_v45 }
 0x2d6   : > { %v830_v48 = vpop.f32.mrf.mxu0 }
 0x2d7   : > { %1109 = shalt.err (!%p1106_p3)
}
 0x2d8   : > { %s1110_s16 = scalar_lea.hbm %s1383_s9, 16  ;;  %s1114_s21 = scalar_lea.hbm %s1431_s7, 32 }
 0x2d9   : > { %p1111_p4 = scmp.ne.s32.totalorder %s1383_s9, %s1110_s16  ;;  %p1115_p9 = scmp.lt.s32.totalorder %s1383_s9, %s1431_s7 }
 0x2da   : > { %p1116_p10 = scmp.lt.s32.totalorder %s1114_s21, %s1110_s16 }
 0x2db   : > { %p1112_p7 = pnand %p1111_p4, %p1240_p5 }
 0x2dc   : > { %p1117_p11 = por %p1116_p10, %p1115_p9 }
 0x2dd   : > { %p1113_p8 = pneg %p1112_p7 }
 0x2df   : > { %p1118_p12 = pnand %p1117_p11, %p1113_p8 }
 0x2e1   : > { %1121 = shalt.err (!%p1118_p12)
}
 0x2e2   : > { %1039 = dma.vmem_to_hbm [thread:$0]  (%p1240_p5), %s1385_s25, 16, %s1383_s9, %s835_s10   ;;  %v1038_v54 = vpop.f32.mrf.mxu0 }
 0x2e3 PF: > { %p1045_p13 = scmp.ge.s32.totalorder %s1156_s29, 2  ;;  %s859_s24 = sand.u32 1, %s1144_s26  }
 0x2e4   : > { %s860_s6 = scalar_lea.sflag [#allocation4], %s859_s24 }
 0x2e5   : > { %p1042_p0 = pnand %p1045_p13, %p1244_p6 }
 0x2e7   : > { %p1043_p1 = pneg %p1042_p0 }
 0x2e9   : > { %1139 = dma.done.wait (%p1043_p1), %s860_s6, 16  }
 0x2ea   : > { %1141 = vsyncadd (%p1043_p1), %s860_s6, 4294967280  ;;  %p19_p2 = scmp.ge.s32.totalorder %s1228_s8, 4   ;;  %s1434_s26 = smov %s1148_s27 }
 0x2eb   : > { %s1435_s27 = smov %s1152_s28  ;;  %s1436_s28 = smov %s1238_s11 }
 0x2ec   : > { %s1437_s29 = smov %s1228_s8  ;;  %21 = sbr.rel (!%p19_p2) target bundleno = 6 (0x6), region = 83 }
 0x2f1   :  { %864 = vsyncpa [#allocation4], 1 }
 0x2f2   :  { %866 = vsyncpa [#allocation4 + $0x1], 1 }

</bundles_post_ra>
